<compile_context>
chip_gen: v7x
topology: tpu7x:2x2x1
jax: 0.10.0
libtpu: 0.0.40
codegen_flags: <defaults>
</compile_context>

<pallas_src>
import jax
import jax.numpy as jnp
from jax.experimental import pallas as pl
from jax.experimental.pallas import tpu as pltpu


def _round_up(x: int, m: int) -> int:
    return ((x + m - 1) // m) * m


def _pad_cast(arr, shape, dtype):
    """Zero-pad to `shape` and cast to `dtype` (no-op if already matching)."""
    if tuple(arr.shape) == tuple(shape) and arr.dtype == jnp.dtype(dtype):
        return arr
    out = jnp.zeros(shape, dtype)
    return out.at[tuple(slice(0, s) for s in arr.shape)].set(arr.astype(dtype))


def _lora_linear_kernel(x_ref, wt_ref, b_ref, xa_ref, bs_ref, o_ref, acc_ref):
    """One (i, j, k) grid step of: out = x @ W^T + bias + (x @ A) @ (alpha*B).

    x_ref  : (tm, tk) bf16   activation tile
    wt_ref : (tk, tn) bf16   pre-transposed weight tile (K, N layout)
    b_ref  : (1,  tn) f32    bias tile
    xa_ref : (tm, rp) bf16   precomputed x @ A tile (constant over j, k)
    bs_ref : (rp, tn) bf16   alpha * B tile (constant over i, k)
    o_ref  : (tm, tn)        output tile
    acc_ref: (tm, tn) f32    VMEM accumulator, persists across the K loop
    """
    k = pl.program_id(2)
    nk = pl.num_programs(2)

    partial = jnp.dot(x_ref[...], wt_ref[...],
                      preferred_element_type=jnp.float32)            # (tm, tn)

    @pl.when(k == 0)
    def _():
        # Initialize with bias + first partial product: no zero-fill pass and
        # one fewer accumulator read-modify-write per output tile.
        acc_ref[...] = b_ref[...] + partial

    @pl.when(k > 0)
    def _():
        acc_ref[...] += partial

    @pl.when(k == nk - 1)
    def _():
        lora = jnp.dot(xa_ref[...], bs_ref[...],
                       preferred_element_type=jnp.float32)            # (tm, tn)
        o_ref[...] = (acc_ref[...] + lora).astype(o_ref.dtype)


def prepare_lora_linear(w, b, a_mat, b_mat, alpha, *,
                        tn=512, tk=1024, rank_pad=128,
                        compute_dtype=jnp.bfloat16):
    """One-time parameter prep (do this at init, not per forward call).

    w:     (out_features, in_features)   -- PyTorch nn.Linear weight layout
    b:     (out_features,)
    a_mat: (in_features, rank)
    b_mat: (rank, out_features)
    alpha: python float (folded into B here; no scalar enters the kernel)
    """
    N, K = w.shape
    r = a_mat.shape[1]

    tn = min(tn, _round_up(N, 128))
    tk = min(tk, _round_up(K, 128))
    Np, Kp = _round_up(N, tn), _round_up(K, tk)
    rp = max(rank_pad, _round_up(r, 8))          # lane-dense LoRA blocks

    params = {
        "wt": _pad_cast(w.T, (Kp, Np), compute_dtype),          # (K, N) layout
        "bias": _pad_cast(b.reshape(1, N), (1, Np), jnp.float32),
        "a": _pad_cast(a_mat, (Kp, rp), compute_dtype),
        "b_scaled": _pad_cast(float(alpha) * b_mat, (rp, Np), compute_dtype),
        "meta": (N, K, Np, Kp, rp, tn, tk),
    }
    return params


def lora_linear_apply(params, x, *, tm=256, out_dtype=jnp.float32):
    """Forward pass using prepared parameters.  x: (batch, in_features)."""
    N, K, Np, Kp, rp, tn, tk = params["meta"]
    compute_dtype = params["wt"].dtype

    M = x.shape[0]
    assert x.shape[1] == K, "input feature mismatch"
    tm = min(tm, _round_up(M, 16))               # bf16 sublane packing
    Mp = _round_up(M, tm)

    xp = _pad_cast(x, (Mp, Kp), compute_dtype)

    # Tiny (Mp, rp) matmul hoisted out of the kernel: removes the cross-j
    # scratch dependency (so the N grid axis can be "parallel" on v7x) and
    # avoids streaming A tiles every K step.
    xa = jnp.dot(xp, params["a"],
                 preferred_element_type=jnp.float32).astype(compute_dtype)

    grid = (Mp // tm, Np // tn, Kp // tk)
    gm, gn, gk = grid

    itemsize = jnp.dtype(compute_dtype).itemsize
    cost = pl.CostEstimate(
        flops=2 * Mp * Np * Kp + 2 * Mp * rp * Np,
        transcendentals=0,
        bytes_accessed=(xp.size * gn + params["wt"].size * gm
                        + xa.size * gn + params["b_scaled"].size * gm) * itemsize
                       + params["bias"].size * 4 * gm
                       + Mp * Np * jnp.dtype(out_dtype).itemsize)

    out = pl.pallas_call(
        _lora_linear_kernel,
        out_shape=jax.ShapeDtypeStruct((Mp, Np), out_dtype),
        grid_spec=pltpu.PrefetchScalarGridSpec(
            num_scalar_prefetch=0,
            grid=grid,
            in_specs=[
                pl.BlockSpec((tm, tk), lambda i, j, k: (i, k)),   # x
                pl.BlockSpec((tk, tn), lambda i, j, k: (k, j)),   # W^T (K, N)
                pl.BlockSpec((1, tn), lambda i, j, k: (0, j)),    # bias
                pl.BlockSpec((tm, rp), lambda i, j, k: (i, 0)),   # xa = x @ A
                pl.BlockSpec((rp, tn), lambda i, j, k: (0, j)),   # alpha * B
            ],
            out_specs=pl.BlockSpec((tm, tn), lambda i, j, k: (i, j)),
            scratch_shapes=[
                pltpu.VMEM((tm, tn), jnp.float32),   # base-path accumulator
            ],
        ),
        compiler_params=pltpu.CompilerParams(
            # Both M and N shard across TensorCores (no cross-j dependence
            # anymore); K is the reduction axis.
            dimension_semantics=("parallel", "parallel", "arbitrary"),
            vmem_limit_bytes=48 * 1024 * 1024,       # fits v7x's 64 MiB VMEM
        ),
        cost_estimate=cost,
    )(xp, params["wt"], params["bias"], xa, params["b_scaled"])

    if (M, N) == (Mp, Np):
        return out                                   # no extra slice copy
    return out[:M, :N]


def linear_with_lora(x, w, b, a_mat, b_mat, alpha, *,
                     tm=256, tn=512, tk=1024, out_dtype=jnp.float32):
    """Convenience one-shot wrapper (prep + apply).  In a real deployment call
    prepare_lora_linear once at init and lora_linear_apply per forward."""
    params = prepare_lora_linear(w, b, a_mat, b_mat, alpha, tn=tn, tk=tk)
    return lora_linear_apply(params, x, tm=tm, out_dtype=out_dtype)


if __name__ == "__main__":
    key = jax.random.PRNGKey(0)
    k1, k2, k3, k4, k5 = jax.random.split(key, 5)

    def reference(x, w, b, a_mat, b_mat, alpha):
        # Same bf16 rounding the kernel applies to MXU inputs, f32 math.
        f = lambda t: t.astype(jnp.bfloat16).astype(jnp.float32)
        xc, wc, ac, bc = f(x), f(w), f(a_mat), f(b_mat)
        return xc @ wc.T + b + alpha * ((xc @ ac) @ bc)

    # --- Test 1: module-faithful small shapes (Linear on 2-D x, LoRA B = 0) ---
    batch, in_f, out_f, rank, alpha = 2, 10, 16, 4, 4.0
    x = jax.random.normal(k1, (batch, in_f), jnp.float32)
    w = jax.random.normal(k2, (out_f, in_f), jnp.float32) * 0.1
    b = jax.random.normal(k3, (out_f,), jnp.float32) * 0.1
    a_mat = (jax.random.normal(k4, (in_f, rank), jnp.float32)
             / jnp.sqrt(jnp.float32(rank)))
    b_mat = jnp.zeros((rank, out_f), jnp.float32)            # module init: B = 0

    out = jax.block_until_ready(linear_with_lora(x, w, b, a_mat, b_mat, alpha))
    ref = reference(x, w, b, a_mat, b_mat, alpha)
    assert out.shape == (batch, out_f)
    assert jnp.allclose(out, ref, atol=1e-2, rtol=1e-2), "test1 mismatch"

    # --- Test 2: multi-tile grid (K accumulation, padding, nonzero LoRA B),
    #             prep once, apply with small tiles to exercise the pipeline. ---
    batch, in_f, out_f, rank, alpha = 24, 288, 320, 8, 2.0
    kk = jax.random.split(k5, 5)
    x = jax.random.normal(kk[0], (batch, in_f), jnp.float32)
    w = jax.random.normal(kk[1], (out_f, in_f), jnp.float32) * 0.05
    b = jax.random.normal(kk[2], (out_f,), jnp.float32) * 0.1
    a_mat = (jax.random.normal(kk[3], (in_f, rank), jnp.float32)
             / jnp.sqrt(jnp.float32(rank)))
    b_mat = jax.random.normal(kk[4], (rank, out_f), jnp.float32) * 0.05

    params = prepare_lora_linear(w, b, a_mat, b_mat, alpha, tn=128, tk=128)
    out = jax.block_until_ready(lora_linear_apply(params, x, tm=16))
    ref = reference(x, w, b, a_mat, b_mat, alpha)
    assert out.shape == (batch, out_f)
    assert jnp.allclose(out, ref, atol=5e-2, rtol=2e-2), "test2 mismatch"

    print("KERNEL_OK")
</pallas_src>

<mosaic_0001>
module attributes {stable_mosaic.version = 11 : i64} {
  func.func @_lora_linear_kernel(%arg0: i32, %arg1: i32, %arg2: i32, %arg3: memref<16x128xbf16, #tpu.memory_space<vmem>>, %arg4: memref<128x128xbf16, #tpu.memory_space<vmem>>, %arg5: memref<1x128xf32, #tpu.memory_space<vmem>>, %arg6: memref<16x128xbf16, #tpu.memory_space<vmem>>, %arg7: memref<128x128xbf16, #tpu.memory_space<vmem>>, %arg8: memref<16x128xf32, #tpu.memory_space<vmem>>, %arg9: memref<16x128xf32, #tpu.memory_space<vmem>>) attributes {dimension_semantics = [#tpu.dimension_semantics<parallel>, #tpu.dimension_semantics<parallel>, #tpu.dimension_semantics<arbitrary>], iteration_bounds = array<i64: 1, 1, 1>, scalar_prefetch = 0 : i64, scratch_operands = 1 : i64, tpu.core_type = #tpu.core_type<tc>, window_params = [{transform_indices = @transform_0, window_bounds = array<i64: 16, 128>}, {transform_indices = @transform_1, window_bounds = array<i64: 128, 128>}, {transform_indices = @transform_2, window_bounds = array<i64: 1, 128>}, {transform_indices = @transform_3, window_bounds = array<i64: 16, 128>}, {transform_indices = @transform_4, window_bounds = array<i64: 128, 128>}, {transform_indices = @transform_5, window_bounds = array<i64: 16, 128>}]} {
    %c0 = arith.constant 0 : index
    %c0_0 = arith.constant 0 : index
    %0 = vector.load %arg3[%c0, %c0_0] : memref<16x128xbf16, #tpu.memory_space<vmem>>, vector<16x128xbf16>
    %c0_1 = arith.constant 0 : index
    %c0_2 = arith.constant 0 : index
    %1 = vector.load %arg4[%c0_1, %c0_2] : memref<128x128xbf16, #tpu.memory_space<vmem>>, vector<128x128xbf16>
    %cst = arith.constant dense<0.000000e+00> : vector<16x128xf32>
    %2 = tpu.matmul %0, %1, %cst {dimension_numbers = #tpu.dot_dimension_numbers<[1], [0], [0], [1], [0, 0, 1, 1], [], []>} : vector<16x128xbf16>, vector<128x128xbf16>, vector<16x128xf32> -> vector<16x128xf32>
    %c0_i32 = arith.constant 0 : i32
    %3 = arith.cmpi eq, %arg2, %c0_i32 : i32
    %4 = arith.extui %3 : i1 to i32
    %c0_i32_3 = arith.constant 0 : i32
    %5 = arith.cmpi ne, %4, %c0_i32_3 : i32
    scf.if %5 {
      %c0_8 = arith.constant 0 : index
      %c0_9 = arith.constant 0 : index
      %12 = vector.load %arg5[%c0_8, %c0_9] : memref<1x128xf32, #tpu.memory_space<vmem>>, vector<1x128xf32>
      %13 = vector.broadcast %12 : vector<1x128xf32> to vector<16x128xf32>
      %14 = arith.addf %13, %2 : vector<16x128xf32>
      %c0_10 = arith.constant 0 : index
      %c0_11 = arith.constant 0 : index
      %15 = vector.load %arg9[%c0_10, %c0_11] : memref<16x128xf32, #tpu.memory_space<vmem>>, vector<16x128xf32>
      tpu.vector_store %arg9[%c0_10, %c0_11], %14 {strides = array<i32>} : memref<16x128xf32, #tpu.memory_space<vmem>>, vector<16x128xf32>,
    } else {
    }
    %c0_i32_4 = arith.constant 0 : i32
    %6 = arith.cmpi sgt, %arg2, %c0_i32_4 : i32
    %7 = arith.extui %6 : i1 to i32
    %c0_i32_5 = arith.constant 0 : i32
    %8 = arith.cmpi ne, %7, %c0_i32_5 : i32
    scf.if %8 {
      %c0_8 = arith.constant 0 : index
      %c0_9 = arith.constant 0 : index
      %12 = vector.load %arg9[%c0_8, %c0_9] : memref<16x128xf32, #tpu.memory_space<vmem>>, vector<16x128xf32>
      %13 = arith.addf %12, %2 : vector<16x128xf32>
      %c0_10 = arith.constant 0 : index
      %c0_11 = arith.constant 0 : index
      %14 = vector.load %arg9[%c0_10, %c0_11] : memref<16x128xf32, #tpu.memory_space<vmem>>, vector<16x128xf32>
      tpu.vector_store %arg9[%c0_10, %c0_11], %13 {strides = array<i32>} : memref<16x128xf32, #tpu.memory_space<vmem>>, vector<16x128xf32>,
    } else {
    }
    %c0_i32_6 = arith.constant 0 : i32
    %9 = arith.cmpi eq, %arg2, %c0_i32_6 : i32
    %10 = arith.extui %9 : i1 to i32
    %c0_i32_7 = arith.constant 0 : i32
    %11 = arith.cmpi ne, %10, %c0_i32_7 : i32
    scf.if %11 {
      %c0_8 = arith.constant 0 : index
      %c0_9 = arith.constant 0 : index
      %12 = vector.load %arg6[%c0_8, %c0_9] : memref<16x128xbf16, #tpu.memory_space<vmem>>, vector<16x128xbf16>
      %c0_10 = arith.constant 0 : index
      %c0_11 = arith.constant 0 : index
      %13 = vector.load %arg7[%c0_10, %c0_11] : memref<128x128xbf16, #tpu.memory_space<vmem>>, vector<128x128xbf16>
      %cst_12 = arith.constant dense<0.000000e+00> : vector<16x128xf32>
      %14 = tpu.matmul %12, %13, %cst_12 {dimension_numbers = #tpu.dot_dimension_numbers<[1], [0], [0], [1], [0, 0, 1, 1], [], []>} : vector<16x128xbf16>, vector<128x128xbf16>, vector<16x128xf32> -> vector<16x128xf32>
      %c0_13 = arith.constant 0 : index
      %c0_14 = arith.constant 0 : index
      %15 = vector.load %arg9[%c0_13, %c0_14] : memref<16x128xf32, #tpu.memory_space<vmem>>, vector<16x128xf32>
      %16 = arith.addf %15, %14 : vector<16x128xf32>
      %c0_15 = arith.constant 0 : index
      %c0_16 = arith.constant 0 : index
      %17 = vector.load %arg8[%c0_15, %c0_16] : memref<16x128xf32, #tpu.memory_space<vmem>>, vector<16x128xf32>
      tpu.vector_store %arg8[%c0_15, %c0_16], %16 {strides = array<i32>} : memref<16x128xf32, #tpu.memory_space<vmem>>, vector<16x128xf32>,
    } else {
    }
    return
  }
  func.func @transform_0(%arg0: i32, %arg1: i32, %arg2: i32) -> (i32, i32) {
    %c0_i32 = arith.constant 0 : i32
    return %arg0, %arg2 : i32, i32
  }
  func.func @transform_1(%arg0: i32, %arg1: i32, %arg2: i32) -> (i32, i32) {
    %c0_i32 = arith.constant 0 : i32
    return %arg2, %arg1 : i32, i32
  }
  func.func @transform_2(%arg0: i32, %arg1: i32, %arg2: i32) -> (i32, i32) {
    %c0_i32 = arith.constant 0 : i32
    %c0_i32_0 = arith.constant 0 : i32
    return %c0_i32, %arg1 : i32, i32
  }
  func.func @transform_3(%arg0: i32, %arg1: i32, %arg2: i32) -> (i32, i32) {
    %c0_i32 = arith.constant 0 : i32
    %c0_i32_0 = arith.constant 0 : i32
    return %arg0, %c0_i32 : i32, i32
  }
  func.func @transform_4(%arg0: i32, %arg1: i32, %arg2: i32) -> (i32, i32) {
    %c0_i32 = arith.constant 0 : i32
    %c0_i32_0 = arith.constant 0 : i32
    return %c0_i32, %arg1 : i32, i32
  }
  func.func @transform_5(%arg0: i32, %arg1: i32, %arg2: i32) -> (i32, i32) {
    %c0_i32 = arith.constant 0 : i32
    return %arg0, %arg1 : i32, i32
  }
}

</mosaic_0001>

<bundles_post_ra>
// kernel: tpu_custom_call.1
= control target key start
LH: loop header
LB: loop body
LE: loop exit
PB: predicated region body
PF: predicated region fallthrough
CT: control target
= control target key end

     0   :  { %10 = vsyncpa [#allocation4], 0  ;;  %s654_s0 = inlined_call_operand.hbm [shape: bf16[16,128], index: 0, kind: input, shape index: {}]   ;;  %s655_s1 = inlined_call_operand.hbm [shape: bf16[128,128], index: 1, kind: input, shape index: {}]   ;;  %s656_s2 = inlined_call_operand.vmem [shape: f32[1,128], index: 2, kind: input, shape index: {}]   ;;  %s657_s3 = inlined_call_operand.vmem [shape: bf16[16,128], index: 3, kind: input, shape index: {}]   ;;  %s658_s4 = inlined_call_operand.hbm [shape: bf16[128,128], index: 4, kind: input, shape index: {}]   ;;  %s659_s5 = inlined_call_operand.hbm [shape: f32[16,128], index: 5, kind: output, shape index: {}]  }
   0x1   :  { %11 = vsyncpa [#allocation7], 0 }
   0x2   :  { %12 = vsyncpa [#allocation5], 0  ;;  %s544_s18 = smov [#allocation6]   ;;  %s545_s20 = smov [#allocation3]  }
   0x3   :  { %s30_s19 = sshll.u32 %s544_s18, 4  ;;  %s18_s21 = sshll.u32 %s545_s20, 4  ;;  %s31_s19 = int_to_ptr.vmem [resolvable:$true] %s30_s19  ;;  %s584_s21 = int_to_ptr.vmem [resolvable:$true] %s18_s21 }
   0x4   :  { %s450_s24 = scalar_lea.hbm %s655_s1, 1024 }
   0x5   :  { %p451_p0 = scmp.ne.s32.totalorder %s655_s1, %s450_s24  ;;  %p454_p1 = scmp.lt.u32.totalorder %s450_s24, %s655_s1 }
   0x7   :  { %p456_p2 = pnand %p454_p1, %p451_p0 }
   0x9   :  { %459 = shalt.err (!%p456_p2)
}
   0xa   :  { %s460_s29 = scalar_lea.vmem %s31_s19, 1024  ;;  %p465_p4 = scmp.lt.s32.totalorder %s31_s19, %s31_s19 }
   0xb   :  { %p461_p3 = scmp.ne.s32.totalorder %s31_s19, %s460_s29  ;;  %p466_p5 = scmp.lt.s32.totalorder %s460_s29, %s460_s29 }
   0xd   :  { %p467_p6 = por %p466_p5, %p465_p4 }
   0xf   :  { %p468_p7 = pnand %p467_p6, %p461_p3 }
  0x11   :  { %471 = shalt.err (!%p468_p7)
}
  0x12   :  { %s546_s30 = smov 64   ;;  %s547_s6 = smov 4  }
  0x13   :  { %36 = dma.hbm_to_vmem [thread:$0]  %s655_s1, 1024, %s31_s19, [#allocation7], %s546_s30, %s546_s30, %s547_s6  }
  0x14   :  { %s472_s11 = scalar_lea.hbm %s654_s0, 128 }
  0x15   :  { %p473_p8 = scmp.ne.s32.totalorder %s654_s0, %s472_s11  ;;  %p476_p9 = scmp.lt.u32.totalorder %s472_s11, %s654_s0 }
  0x17   :  { %p478_p10 = pnand %p476_p9, %p473_p8 }
  0x19   :  { %481 = shalt.err (!%p478_p10)
}
  0x1a   :  { %s482_s16 = scalar_lea.vmem %s584_s21, 128  ;;  %p487_p12 = scmp.lt.s32.totalorder %s584_s21, %s584_s21 }
  0x1b   :  { %p483_p11 = scmp.ne.s32.totalorder %s584_s21, %s482_s16  ;;  %p488_p13 = scmp.lt.s32.totalorder %s482_s16, %s482_s16 }
  0x1d   :  { %p489_p0 = por %p488_p13, %p487_p12 }
  0x1f   :  { %p490_p1 = pnand %p489_p0, %p483_p11 }
  0x21   :  { %493 = shalt.err (!%p490_p1)
}
  0x22   :  { %24 = dma.hbm_to_vmem [thread:$0]  %s654_s0, 128, %s584_s21, [#allocation4], %s546_s30, %s546_s30, %s547_s6  }
  0x23   :  { %s548_s18 = smov [#allocation8]   ;;  %s494_s23 = scalar_lea.hbm %s658_s4, 1024 }
  0x24   :  { %s46_s19 = sshll.u32 %s548_s18, 4  ;;  %p495_p2 = scmp.ne.s32.totalorder %s658_s4, %s494_s23  ;;  %s47_s19 = int_to_ptr.vmem [resolvable:$true] %s46_s19 }
  0x25   :  { %p498_p3 = scmp.lt.u32.totalorder %s494_s23, %s658_s4 }
  0x27   :  { %p500_p4 = pnand %p498_p3, %p495_p2 }
  0x29   :  { %503 = shalt.err (!%p500_p4)
}
  0x2a   :  { %s504_s28 = scalar_lea.vmem %s47_s19, 1024  ;;  %p509_p6 = scmp.lt.s32.totalorder %s47_s19, %s47_s19 }
  0x2b   :  { %p505_p5 = scmp.ne.s32.totalorder %s47_s19, %s504_s28  ;;  %p510_p7 = scmp.lt.s32.totalorder %s504_s28, %s504_s28 }
  0x2d   :  { %p511_p8 = por %p510_p7, %p509_p6 }
  0x2f   :  { %p512_p9 = pnand %p511_p8, %p505_p5 }
  0x31   :  { %515 = shalt.err (!%p512_p9)
}
  0x32   :  { %52 = dma.hbm_to_vmem [thread:$0]  %s658_s4, 1024, %s47_s19, [#allocation7], %s546_s30, %s546_s30, %s547_s6  }
  0x33   :  { %538 = dma.done.wait [#allocation4], 128  }
  0x34   :  { %539 = vsyncadd [#allocation4], 4294967168 }
  0x35   :  { %540 = dma.done.wait [#allocation7], 2048  }
  0x36   :  { %541 = vsyncadd [#allocation7], 4294965248  ;;  %v549_v0 = vmov 0.0   ;;  %vm550_vm0 = vmmov 0   ;;  %v432_v1 = vld [vmem:[#allocation6] sm:$0xff]   ;;  %v434_v3 = vld [vmem:[#allocation6 + $0x8] sm:$0xff]  }
  0x37   :  { %378 = vmatprep.subr.bf16.mxu1 %v549_v0  ;;  %398 = vmatprep.subr.bf16.mxu0 %v549_v0  ;;  %v433_v2 = vld [vmem:[#allocation8] sm:$0xff]   ;;  %v435_v4 = vld [vmem:[#allocation8 + $0x8] sm:$0xff]   ;;  %v436_v5 = vld [vmem:[#allocation6 + $0x10] sm:$0xff]   ;;  %s551_s7 = smov [#allocation9]  }
  0x38   :  { %394 = vmatprep.mubr.msk.bf16.mxu1 %vm550_vm0, %v549_v0  ;;  %414 = vmatprep.mubr.msk.bf16.mxu0 %vm550_vm0, %v549_v0  ;;  %v437_v6 = vld [vmem:[#allocation8 + $0x10] sm:$0xff]   ;;  %v438_v7 = vld [vmem:[#allocation6 + $0x18] sm:$0xff]   ;;  %v440_v9 = vld [vmem:[#allocation6 + $0x20] sm:$0xff]   ;;  %s328_s8 = sshll.u32 %s551_s7, 4  ;;  %s329_s8 = int_to_ptr.vmem [resolvable:$true] %s328_s8 }
  0x39   :  { %379 = vmatpush3.bf16.msra.mxu1 %v432_v1  ;;  %399 = vmatpush3.bf16.msra.mxu0 %v433_v2  ;;  %v439_v8 = vld [vmem:[#allocation8 + $0x18] sm:$0xff]   ;;  %v441_v10 = vld [vmem:[#allocation8 + $0x20] sm:$0xff]   ;;  %v442_v11 = vld [vmem:[#allocation6 + $0x28] sm:$0xff]   ;;  %p521_p11 = scmp.lt.s32.totalorder %s329_s8, %s329_s8 }
  0x3a   :  { %380 = vmatprep.subr.bf16.mxu1 %v549_v0  ;;  %400 = vmatprep.subr.bf16.mxu0 %v549_v0  ;;  %v443_v12 = vld [vmem:[#allocation8 + $0x28] sm:$0xff]   ;;  %v444_v13 = vld [vmem:[#allocation6 + $0x30] sm:$0xff]   ;;  %v446_v15 = vld [vmem:[#allocation6 + $0x38] sm:$0xff]  }
  0x3b   :  { %v445_v14 = vld [vmem:[#allocation8 + $0x30] sm:$0xff]   ;;  %v447_v16 = vld [vmem:[#allocation8 + $0x38] sm:$0xff]  }
  0x3c   :  { %v448_v17 = vld [vmem:[#allocation3] sm:$0xff]  }
  0x3d   :  { %381 = vmatpush3.bf16.msra.mxu1 %v434_v3  ;;  %401 = vmatpush3.bf16.msra.mxu0 %v435_v4  ;;  %v449_v18 = vld [vmem:[%s657_s3] sm:$0xff]   ;;  %s516_s3 = scalar_lea.vmem %s329_s8, 256 }
  0x3e   :  { %382 = vmatprep.subr.bf16.mxu1 %v549_v0  ;;  %402 = vmatprep.subr.bf16.mxu0 %v549_v0  ;;  %v350_v19 = vld [vmem:[%s656_s2] ss:$0 sm:$0xff]  ;;  %p517_p10 = scmp.ne.s32.totalorder %s329_s8, %s516_s3  ;;  %p522_p12 = scmp.lt.s32.totalorder %s516_s3, %s516_s3 }
  0x40   :  { %p523_p13 = por %p522_p12, %p521_p11 }
  0x41   :  { %383 = vmatpush3.bf16.msra.mxu1 %v436_v5  ;;  %403 = vmatpush3.bf16.msra.mxu0 %v437_v6 }
  0x42   :  { %384 = vmatprep.subr.bf16.mxu1 %v549_v0  ;;  %404 = vmatprep.subr.bf16.mxu0 %v549_v0  ;;  %p524_p0 = pnand %p523_p13, %p517_p10 }
  0x45   :  { %385 = vmatpush3.bf16.msra.mxu1 %v438_v7  ;;  %405 = vmatpush3.bf16.msra.mxu0 %v439_v8 }
  0x46   :  { %386 = vmatprep.subr.bf16.mxu1 %v549_v0  ;;  %406 = vmatprep.subr.bf16.mxu0 %v549_v0 }
  0x49   :  { %387 = vmatpush3.bf16.msra.mxu1 %v440_v9  ;;  %407 = vmatpush3.bf16.msra.mxu0 %v441_v10 }
  0x4a   :  { %388 = vmatprep.subr.bf16.mxu1 %v549_v0  ;;  %408 = vmatprep.subr.bf16.mxu0 %v549_v0 }
  0x4d   :  { %389 = vmatpush3.bf16.msra.mxu1 %v442_v11  ;;  %409 = vmatpush3.bf16.msra.mxu0 %v443_v12 }
  0x4e   :  { %390 = vmatprep.subr.bf16.mxu1 %v549_v0  ;;  %410 = vmatprep.subr.bf16.mxu0 %v549_v0 }
  0x51   :  { %391 = vmatpush3.bf16.msra.mxu1 %v444_v13  ;;  %411 = vmatpush3.bf16.msra.mxu0 %v445_v14 }
  0x52   :  { %392 = vmatprep.subr.bf16.mxu1 %v549_v0  ;;  %412 = vmatprep.subr.bf16.mxu0 %v549_v0 }
  0x55   :  { %393 = vmatpush3.bf16.msra.mxu1 %v446_v15  ;;  %413 = vmatpush3.bf16.msra.mxu0 %v447_v16 }
  0x58   :  { %395 = vmatmul.mubr.bf16.vlgmr.msra.gmra.mrb[0].mxu1 %v448_v17  ;;  %415 = vmatmul.mubr.bf16.vlgmr.msra.gmra.mrb[0].mxu0 %v449_v18 }
 0x12b   :  { %v169_v20 = vpop.f32.mrb[0].mxu1  ;;  %v310_v22 = vpop.f32.mrb[0].mxu0 }
 0x12c   :  { %v187_v21 = vadd.f32 %v350_v19, %v169_v20  ;;  %v396_v23 = vpop.f32.mrb[1].mxu1  ;;  %v416_v24 = vpop.f32.mrb[1].mxu0 }
 0x12d   :  { %v172_v25 = vpop.f32.mrb[2].mxu1  ;;  %v313_v28 = vpop.f32.mrb[2].mxu0 }
 0x12e   :  { %v319_v26 = vadd.f32 %v310_v22, %v187_v21  ;;  %v188_v27 = vadd.f32 %v350_v19, %v172_v25  ;;  %v397_v29 = vpop.f32.mrb[3].mxu1  ;;  %v417_v30 = vpop.f32.mrb[3].mxu0 }
 0x130   :  { %321 = vst [vmem:[#allocation9] sm:$0xff] %v319_v26  ;;  %v320_v31 = vadd.f32 %v313_v28, %v188_v27 }
 0x132   :  { %322 = vst [vmem:[#allocation9 + $0x8] sm:$0xff] %v320_v31 }
 0x133   :  { %527 = shalt.err (!%p524_p0)
}
 0x134   :  { %s528_s10 = scalar_lea.hbm %s659_s5, 256 }
 0x135   :  { %p529_p1 = scmp.ne.s32.totalorder %s659_s5, %s528_s10  ;;  %p532_p2 = scmp.lt.u32.totalorder %s528_s10, %s659_s5 }
 0x137   :  { %p534_p3 = pnand %p532_p2, %p529_p1 }
 0x139   :  { %537 = shalt.err (!%p534_p3)
}
 0x13a   :  { %s552_s15 = smov 128   ;;  %s553_s16 = smov 8  }
 0x13b   :  { %334 = dma.vmem_to_hbm [thread:$0]  %s329_s8, 256, %s659_s5, [#allocation5], %s552_s15, %s552_s15, %s553_s16  }
 0x13c   :  { %542 = dma.done.wait [#allocation5], 256  }
 0x13d   :  { %543 = vsyncadd [#allocation5], 4294967040 }
 0x13e   :  { %338 = vsyncpa [#allocation4], 1 }
 0x13f   :  { %339 = vsyncpa [#allocation7], 1 }
 0x140   :  { %340 = vsyncpa [#allocation5], 1 }

</bundles_post_ra>
